<compile_context>
chip_gen: v6e
topology: v6e:2x2x1
jax: 0.10.0
libtpu: 0.0.40
codegen_flags: <defaults>
</compile_context>

<pallas_src>
import jax
import jax.numpy as jnp
from jax.experimental import pallas as pl
from jax.experimental.pallas import tpu as pltpu

K_IN = 784           # 28*28 (full last dim of x -> legal non-128 block width)
N_OUT = 10
H3 = 64              # fc3 true width
H3P = 128            # fc3 padded (lane-dense) width
N_PAD = 128          # lane-dense output width
NEG_BIG = -1e30      # pad bias value -> padded logits vanish in log_softmax


# ----------------------------- Pallas kernel --------------------------------
def mlp_kernel(x_ref, w1_ref, b1_ref, w2_ref, b2_ref,
               w3_ref, b3_ref, w4_ref, b4_ref, out_ref):
    # In-kernel bf16 cast (no wrapper-side pad/cast materialization of x).
    x = x_ref[...].astype(jnp.bfloat16)
    # fc1 + relu   (dropout = identity in eval mode)
    h = jnp.dot(x, w1_ref[...], preferred_element_type=jnp.float32)
    h = jnp.maximum(h + b1_ref[...], 0.0)
    # fc2 + relu
    h = jnp.dot(h.astype(jnp.bfloat16), w2_ref[...],
                preferred_element_type=jnp.float32)
    h = jnp.maximum(h + b2_ref[...], 0.0)
    # fc3 + relu (padded 64 -> 128 lanes; padded cols are exactly 0 after relu)
    h = jnp.dot(h.astype(jnp.bfloat16), w3_ref[...],
                preferred_element_type=jnp.float32)
    h = jnp.maximum(h + b3_ref[...], 0.0)
    # fc4 (padded to 128 lanes; padded bias = -1e30 so padded logits -> exp == 0)
    logits = jnp.dot(h.astype(jnp.bfloat16), w4_ref[...],
                     preferred_element_type=jnp.float32) + b4_ref[...]
    # numerically-stable log_softmax over the (padded) class axis
    m = jnp.max(logits, axis=-1, keepdims=True)
    s = logits - m
    lse = jnp.log(jnp.sum(jnp.exp(s), axis=-1, keepdims=True))
    out_ref[...] = s - lse


# ------------------------------- wrapper -------------------------------------
def _round_up(x, m):
    return (x + m - 1) // m * m


def _vmem_limit_bytes():
    """Generation-aware scoped-VMEM limit: ~75% of physical per-core VMEM.
    v5e/v6e: 128 MiB physical -> 96 MiB; v7x: 64 MiB physical -> 48 MiB."""
    cap = None
    try:
        cap = pltpu.get_tpu_info().vmem_capacity_bytes
    except Exception:
        cap = None
    if not cap:
        cap = 64 * 1024 * 1024      # conservative fallback (v7x per-core VMEM)
    return int(cap) * 3 // 4


def _max_batch_tile(vmem_limit):
    # Per-row VMEM (bytes), double-buffered in/out tiles + intermediates:
    #   x   f32 (tb,784) x2 bufs : 6272
    #   out f32 (tb,128) x2 bufs : 1024
    #   h1/h2/h3/logits f32      : (256+128+128+128)*4 = 2560
    #   bf16 casts               : (784+256+128+128)*2 = 2592
    #   -> ~12.5 KiB / row (+ ~1 MiB resident bf16 weights)
    # tb=2048 -> ~26 MiB (fits v7x 48 MiB budget), tb=4096 -> ~52 MiB (v5e/v6e only).
    return 4096 if vmem_limit >= 80 * 1024 * 1024 else 2048


def _default_batch_tile(B, tb_cap):
    # bf16 native tile is (16, 128) -> keep tb a multiple of 16.
    if B <= 64:
        return _round_up(max(B, 16), 16)           # tiny batch: single step
    # Guarantee >= 2 grid steps (both v7x TensorCores + DMA/compute overlap)
    # while amortizing the ~0.35 us per-grid-step overhead with large tiles.
    return min(tb_cap, _round_up(pl.cdiv(B, 2), 16))


def _full_spec(arr):
    nd = arr.ndim
    return pl.BlockSpec(arr.shape, lambda i, _nd=nd: (0,) * _nd)


def my_awesome_model_forward(x_nchw, params, *, batch_tile=None):
    """x_nchw: [B, 1, 28, 28] float32. Returns log-probabilities [B, 10] (float32)."""
    B = x_nchw.shape[0]
    x = x_nchw.reshape(B, -1).astype(jnp.float32)
    assert x.shape[1] == K_IN, \
        "Expected flattened MNIST samples of size 28*28 = 784"

    w1, b1, w2, b2, w3, b3, w4, b4 = params

    # --- parameter prep (tiny, one-time): bf16 weights, lane-dense fc3/fc4 ---
    w1b = w1.astype(jnp.bfloat16)                                          # (784, 256)
    w2b = w2.astype(jnp.bfloat16)                                          # (256, 128)
    w3p = jnp.pad(w3, ((0, 0), (0, H3P - H3))).astype(jnp.bfloat16)        # (128, 128)
    w4p = jnp.pad(w4, ((0, H3P - H3), (0, N_PAD - N_OUT))).astype(jnp.bfloat16)  # (128, 128)
    b1f = b1.astype(jnp.float32)                                           # (1, 256)
    b2f = b2.astype(jnp.float32)                                           # (1, 128)
    b3p = jnp.pad(b3.astype(jnp.float32), ((0, 0), (0, H3P - H3)))         # (1, 128)
    b4p = jnp.pad(b4.astype(jnp.float32), ((0, 0), (0, N_PAD - N_OUT)),
                  constant_values=NEG_BIG)                                 # (1, 128)

    # --- generation-aware VMEM budget and batch tiling ---
    vmem_limit = _vmem_limit_bytes()
    tb_cap = _max_batch_tile(vmem_limit)
    tb = _default_batch_tile(B, tb_cap) if batch_tile is None else batch_tile
    assert tb % 16 == 0, "batch_tile must be a multiple of 16 (bf16 sublane tiling)"
    B_pad = _round_up(B, tb)
    xp = x if B_pad == B else jnp.pad(x, ((0, B_pad - B), (0, 0)))   # no copy if aligned

    out = pl.pallas_call(
        mlp_kernel,
        out_shape=jax.ShapeDtypeStruct((B_pad, N_PAD), jnp.float32),
        grid_spec=pltpu.PrefetchScalarGridSpec(
            num_scalar_prefetch=0,
            grid=(B_pad // tb,),
            in_specs=[
                pl.BlockSpec((tb, K_IN), lambda i: (i, 0)),   # f32 x tile (cast in-kernel)
                _full_spec(w1b), _full_spec(b1f),
                _full_spec(w2b), _full_spec(b2f),
                _full_spec(w3p), _full_spec(b3p),
                _full_spec(w4p), _full_spec(b4p),
            ],
            out_specs=pl.BlockSpec((tb, N_PAD), lambda i: (i, 0)),
        ),
        compiler_params=pltpu.CompilerParams(
            dimension_semantics=("parallel",),
            vmem_limit_bytes=vmem_limit,
        ),
    )(xp, w1b, b1f, w2b, b2f, w3p, b3p, w4p, b4p)

    # TODO(synk): a downstream consumer that can read the padded (B_pad, 128) block
    # directly (e.g. a fused loss) should skip this slice to save an output pass.
    return out[:B, :N_OUT]


# ------------------------- deterministic param init --------------------------
def init_params(key):
    """PyTorch-Linear-like uniform init (deterministic).  Weights are stored
    pre-transposed as [in, out] so the kernel computes x @ W + b."""
    dims = [(784, 256), (256, 128), (128, 64), (64, 10)]
    params = []
    for (fan_in, fan_out) in dims:
        key, kw, kb = jax.random.split(key, 3)
        bound = 1.0 / (fan_in ** 0.5)
        w = jax.random.uniform(kw, (fan_in, fan_out), jnp.float32, -bound, bound)
        b = jax.random.uniform(kb, (1, fan_out), jnp.float32, -bound, bound)
        params.extend([w, b])
    return tuple(params)


# ----------------------- pure-JAX reference (bf16-matched) -------------------
def _reference_forward(x_nchw, params):
    """Reference with the same bf16 weight/input quantization as the kernel."""
    B = x_nchw.shape[0]
    x = x_nchw.reshape(B, -1)
    w1, b1, w2, b2, w3, b3, w4, b4 = params

    def dot_bf16(a, w):
        return jnp.dot(a.astype(jnp.bfloat16), w.astype(jnp.bfloat16),
                       preferred_element_type=jnp.float32)

    h = jnp.maximum(dot_bf16(x, w1) + b1, 0.0)
    h = jnp.maximum(dot_bf16(h, w2) + b2, 0.0)
    h = jnp.maximum(dot_bf16(h, w3) + b3, 0.0)
    logits = dot_bf16(h, w4) + b4
    return jax.nn.log_softmax(logits, axis=-1)


if __name__ == "__main__":
    key = jax.random.PRNGKey(0)
    k_params, k_x = jax.random.split(key)

    params = init_params(k_params)
    x = jax.random.normal(k_x, (8, 1, 28, 28), dtype=jnp.float32)  # small MNIST-shaped batch

    fwd = jax.jit(my_awesome_model_forward)
    out = jax.block_until_ready(fwd(x, params))

    # sanity checks
    assert out.shape == (8, 10)
    assert bool(jnp.all(jnp.isfinite(out)))
    row_sums = jnp.sum(jnp.exp(out), axis=-1)
    assert bool(jnp.allclose(row_sums, 1.0, atol=1e-3))

    ref = _reference_forward(x, params)
    assert bool(jnp.allclose(out, ref, atol=5e-2, rtol=5e-2))

    print("KERNEL_OK")
</pallas_src>

<mosaic_0001>
module attributes {stable_mosaic.version = 11 : i64} {
  func.func @mlp_kernel(%arg0: i32, %arg1: memref<16x784xf32, #tpu.memory_space<vmem>>, %arg2: memref<784x256xbf16, #tpu.memory_space<vmem>>, %arg3: memref<1x256xf32, #tpu.memory_space<vmem>>, %arg4: memref<256x128xbf16, #tpu.memory_space<vmem>>, %arg5: memref<1x128xf32, #tpu.memory_space<vmem>>, %arg6: memref<128x128xbf16, #tpu.memory_space<vmem>>, %arg7: memref<1x128xf32, #tpu.memory_space<vmem>>, %arg8: memref<128x128xbf16, #tpu.memory_space<vmem>>, %arg9: memref<1x128xf32, #tpu.memory_space<vmem>>, %arg10: memref<16x128xf32, #tpu.memory_space<vmem>>) attributes {dimension_semantics = [#tpu.dimension_semantics<parallel>], iteration_bounds = array<i64: 1>, scalar_prefetch = 0 : i64, scratch_operands = 0 : i64, tpu.core_type = #tpu.core_type<tc>, window_params = [{transform_indices = @transform_0, window_bounds = array<i64: 16, 784>}, {pipeline_mode = #tpu.pipeline_mode<synchronous>, transform_indices = @transform_1, window_bounds = array<i64: 784, 256>}, {pipeline_mode = #tpu.pipeline_mode<synchronous>, transform_indices = @transform_2, window_bounds = array<i64: 1, 256>}, {pipeline_mode = #tpu.pipeline_mode<synchronous>, transform_indices = @transform_3, window_bounds = array<i64: 256, 128>}, {pipeline_mode = #tpu.pipeline_mode<synchronous>, transform_indices = @transform_4, window_bounds = array<i64: 1, 128>}, {pipeline_mode = #tpu.pipeline_mode<synchronous>, transform_indices = @transform_5, window_bounds = array<i64: 128, 128>}, {pipeline_mode = #tpu.pipeline_mode<synchronous>, transform_indices = @transform_6, window_bounds = array<i64: 1, 128>}, {pipeline_mode = #tpu.pipeline_mode<synchronous>, transform_indices = @transform_7, window_bounds = array<i64: 128, 128>}, {pipeline_mode = #tpu.pipeline_mode<synchronous>, transform_indices = @transform_8, window_bounds = array<i64: 1, 128>}, {transform_indices = @transform_9, window_bounds = array<i64: 16, 128>}]} {
    %c0 = arith.constant 0 : index
    %c0_0 = arith.constant 0 : index
    %0 = vector.load %arg1[%c0, %c0_0] : memref<16x784xf32, #tpu.memory_space<vmem>>, vector<16x784xf32>
    %1 = arith.truncf %0 : vector<16x784xf32> to vector<16x784xbf16>
    %c0_1 = arith.constant 0 : index
    %c0_2 = arith.constant 0 : index
    %2 = vector.load %arg2[%c0_1, %c0_2] : memref<784x256xbf16, #tpu.memory_space<vmem>>, vector<784x256xbf16>
    %cst = arith.constant dense<0.000000e+00> : vector<16x256xf32>
    %3 = tpu.matmul %1, %2, %cst {dimension_numbers = #tpu.dot_dimension_numbers<[1], [0], [0], [1], [0, 0, 1, 1], [], []>} : vector<16x784xbf16>, vector<784x256xbf16>, vector<16x256xf32> -> vector<16x256xf32>
    %c0_3 = arith.constant 0 : index
    %c0_4 = arith.constant 0 : index
    %4 = vector.load %arg3[%c0_3, %c0_4] : memref<1x256xf32, #tpu.memory_space<vmem>>, vector<1x256xf32>
    %5 = vector.broadcast %4 : vector<1x256xf32> to vector<16x256xf32>
    %6 = arith.addf %3, %5 : vector<16x256xf32>
    %cst_5 = arith.constant 0.000000e+00 : f32
    %7 = vector.broadcast %cst_5 : f32 to vector<16x256xf32>
    %8 = arith.maximumf %6, %7 : vector<16x256xf32>
    %9 = arith.truncf %8 : vector<16x256xf32> to vector<16x256xbf16>
    %c0_6 = arith.constant 0 : index
    %c0_7 = arith.constant 0 : index
    %10 = vector.load %arg4[%c0_6, %c0_7] : memref<256x128xbf16, #tpu.memory_space<vmem>>, vector<256x128xbf16>
    %cst_8 = arith.constant dense<0.000000e+00> : vector<16x128xf32>
    %11 = tpu.matmul %9, %10, %cst_8 {dimension_numbers = #tpu.dot_dimension_numbers<[1], [0], [0], [1], [0, 0, 1, 1], [], []>} : vector<16x256xbf16>, vector<256x128xbf16>, vector<16x128xf32> -> vector<16x128xf32>
    %c0_9 = arith.constant 0 : index
    %c0_10 = arith.constant 0 : index
    %12 = vector.load %arg5[%c0_9, %c0_10] : memref<1x128xf32, #tpu.memory_space<vmem>>, vector<1x128xf32>
    %13 = vector.broadcast %12 : vector<1x128xf32> to vector<16x128xf32>
    %14 = arith.addf %11, %13 : vector<16x128xf32>
    %cst_11 = arith.constant 0.000000e+00 : f32
    %15 = vector.broadcast %cst_11 : f32 to vector<16x128xf32>
    %16 = arith.maximumf %14, %15 : vector<16x128xf32>
    %17 = arith.truncf %16 : vector<16x128xf32> to vector<16x128xbf16>
    %c0_12 = arith.constant 0 : index
    %c0_13 = arith.constant 0 : index
    %18 = vector.load %arg6[%c0_12, %c0_13] : memref<128x128xbf16, #tpu.memory_space<vmem>>, vector<128x128xbf16>
    %cst_14 = arith.constant dense<0.000000e+00> : vector<16x128xf32>
    %19 = tpu.matmul %17, %18, %cst_14 {dimension_numbers = #tpu.dot_dimension_numbers<[1], [0], [0], [1], [0, 0, 1, 1], [], []>} : vector<16x128xbf16>, vector<128x128xbf16>, vector<16x128xf32> -> vector<16x128xf32>
    %c0_15 = arith.constant 0 : index
    %c0_16 = arith.constant 0 : index
    %20 = vector.load %arg7[%c0_15, %c0_16] : memref<1x128xf32, #tpu.memory_space<vmem>>, vector<1x128xf32>
    %21 = vector.broadcast %20 : vector<1x128xf32> to vector<16x128xf32>
    %22 = arith.addf %19, %21 : vector<16x128xf32>
    %cst_17 = arith.constant 0.000000e+00 : f32
    %23 = vector.broadcast %cst_17 : f32 to vector<16x128xf32>
    %24 = arith.maximumf %22, %23 : vector<16x128xf32>
    %25 = arith.truncf %24 : vector<16x128xf32> to vector<16x128xbf16>
    %c0_18 = arith.constant 0 : index
    %c0_19 = arith.constant 0 : index
    %26 = vector.load %arg8[%c0_18, %c0_19] : memref<128x128xbf16, #tpu.memory_space<vmem>>, vector<128x128xbf16>
    %cst_20 = arith.constant dense<0.000000e+00> : vector<16x128xf32>
    %27 = tpu.matmul %25, %26, %cst_20 {dimension_numbers = #tpu.dot_dimension_numbers<[1], [0], [0], [1], [0, 0, 1, 1], [], []>} : vector<16x128xbf16>, vector<128x128xbf16>, vector<16x128xf32> -> vector<16x128xf32>
    %c0_21 = arith.constant 0 : index
    %c0_22 = arith.constant 0 : index
    %28 = vector.load %arg9[%c0_21, %c0_22] : memref<1x128xf32, #tpu.memory_space<vmem>>, vector<1x128xf32>
    %29 = vector.broadcast %28 : vector<1x128xf32> to vector<16x128xf32>
    %30 = arith.addf %27, %29 : vector<16x128xf32>
    %cst_23 = arith.constant dense<0xFF800000> : vector<16xf32>
    %31 = vector.multi_reduction <maximumf>, %30, %cst_23 [1] : vector<16x128xf32> to vector<16xf32>
    %32 = vector.shape_cast %31 : vector<16xf32> to vector<16x1xf32>
    %33 = vector.broadcast %32 : vector<16x1xf32> to vector<16x128xf32>
    %34 = arith.subf %30, %33 : vector<16x128xf32>
    %35 = math.exp %34 : vector<16x128xf32>
    %cst_24 = arith.constant dense<0.000000e+00> : vector<16xf32>
    %36 = vector.multi_reduction <add>, %35, %cst_24 [1] : vector<16x128xf32> to vector<16xf32>
    %37 = vector.shape_cast %36 : vector<16xf32> to vector<16x1xf32>
    %38 = math.log %37 : vector<16x1xf32>
    %39 = vector.broadcast %38 : vector<16x1xf32> to vector<16x128xf32>
    %40 = arith.subf %34, %39 : vector<16x128xf32>
    %c0_25 = arith.constant 0 : index
    %c0_26 = arith.constant 0 : index
    %41 = vector.load %arg10[%c0_25, %c0_26] : memref<16x128xf32, #tpu.memory_space<vmem>>, vector<16x128xf32>
    tpu.vector_store %arg10[%c0_25, %c0_26], %40 {strides = array<i32>} : memref<16x128xf32, #tpu.memory_space<vmem>>, vector<16x128xf32>,
    return
  }
  func.func @transform_0(%arg0: i32) -> (i32, i32) {
    %c0_i32 = arith.constant 0 : i32
    %c0_i32_0 = arith.constant 0 : i32
    return %arg0, %c0_i32 : i32, i32
  }
  func.func @transform_1(%arg0: i32) -> (i32, i32) {
    %c0_i32 = arith.constant 0 : i32
    %c0_i32_0 = arith.constant 0 : i32
    %c0_i32_1 = arith.constant 0 : i32
    return %c0_i32, %c0_i32_0 : i32, i32
  }
  func.func @transform_2(%arg0: i32) -> (i32, i32) {
    %c0_i32 = arith.constant 0 : i32
    %c0_i32_0 = arith.constant 0 : i32
    %c0_i32_1 = arith.constant 0 : i32
    return %c0_i32, %c0_i32_0 : i32, i32
  }
  func.func @transform_3(%arg0: i32) -> (i32, i32) {
    %c0_i32 = arith.constant 0 : i32
    %c0_i32_0 = arith.constant 0 : i32
    %c0_i32_1 = arith.constant 0 : i32
    return %c0_i32, %c0_i32_0 : i32, i32
  }
  func.func @transform_4(%arg0: i32) -> (i32, i32) {
    %c0_i32 = arith.constant 0 : i32
    %c0_i32_0 = arith.constant 0 : i32
    %c0_i32_1 = arith.constant 0 : i32
    return %c0_i32, %c0_i32_0 : i32, i32
  }
  func.func @transform_5(%arg0: i32) -> (i32, i32) {
    %c0_i32 = arith.constant 0 : i32
    %c0_i32_0 = arith.constant 0 : i32
    %c0_i32_1 = arith.constant 0 : i32
    return %c0_i32, %c0_i32_0 : i32, i32
  }
  func.func @transform_6(%arg0: i32) -> (i32, i32) {
    %c0_i32 = arith.constant 0 : i32
    %c0_i32_0 = arith.constant 0 : i32
    %c0_i32_1 = arith.constant 0 : i32
    return %c0_i32, %c0_i32_0 : i32, i32
  }
  func.func @transform_7(%arg0: i32) -> (i32, i32) {
    %c0_i32 = arith.constant 0 : i32
    %c0_i32_0 = arith.constant 0 : i32
    %c0_i32_1 = arith.constant 0 : i32
    return %c0_i32, %c0_i32_0 : i32, i32
  }
  func.func @transform_8(%arg0: i32) -> (i32, i32) {
    %c0_i32 = arith.constant 0 : i32
    %c0_i32_0 = arith.constant 0 : i32
    %c0_i32_1 = arith.constant 0 : i32
    return %c0_i32, %c0_i32_0 : i32, i32
  }
  func.func @transform_9(%arg0: i32) -> (i32, i32) {
    %c0_i32 = arith.constant 0 : i32
    %c0_i32_0 = arith.constant 0 : i32
    return %arg0, %c0_i32 : i32, i32
  }
}

</mosaic_0001>

<bundles_post_ra>
// kernel: my_awesome_model_forward.1
= control target key start
LH: loop header
LB: loop body
LE: loop exit
PB: predicated region body
PF: predicated region fallthrough
CT: control target
= control target key end

     0   :  { %vm654_vm0 = vcmask 130048   ;;  %vm1674_vm1 = vmmov 0   ;;  %s2193_s1 = inlined_call_operand.vmem [shape: bf16[784,256], index: 1, kind: input, shape index: {}]   ;;  %s2194_s0 = inlined_call_operand.vmem [shape: f32[16,784], index: 0, kind: input, shape index: {}]   ;;  %s2195_s3 = inlined_call_operand.vmem [shape: bf16[256,128], index: 3, kind: input, shape index: {}]   ;;  %s2196_s5 = inlined_call_operand.vmem [shape: bf16[128,128], index: 5, kind: input, shape index: {}]   ;;  %s2197_s2 = inlined_call_operand.vmem [shape: f32[1,256], index: 2, kind: input, shape index: {}]   ;;  %s2198_s7 = inlined_call_operand.vmem [shape: bf16[128,128], index: 7, kind: input, shape index: {}]   ;;  %s2199_s4 = inlined_call_operand.vmem [shape: f32[1,128], index: 4, kind: input, shape index: {}]   ;;  %s2200_s6 = inlined_call_operand.vmem [shape: f32[1,128], index: 6, kind: input, shape index: {}]   ;;  %s2201_s8 = inlined_call_operand.vmem [shape: f32[1,128], index: 8, kind: input, shape index: {}]   ;;  %s2202_s9 = inlined_call_operand.vmem [shape: f32[16,128], index: 9, kind: output, shape index: {}]  }
   0x1   :  { %v1485_v0 = vld [vmem:[%s2193_s1 + $0x74] ss:$8 sps:$4 sm:$0xff]   ;;  %v1487_v1 = vld [vmem:[%s2193_s1 + $0x70] ss:$8 sps:$4 sm:$0xff]   ;;  %v1491_v4 = vld [vmem:[%s2193_s1 + $0x64] ss:$8 sps:$4 sm:$0xff]  }
   0x2   :  { %658 = vmatprep.subr.bf16.mxu0 %v1485_v0  ;;  %v1488_v2 = vld [vmem:[%s2193_s1 + $0x174] ss:$8 sps:$4 sm:$0xff]   ;;  %v1490_v3 = vld [vmem:[%s2193_s1 + $0x170] ss:$8 sps:$4 sm:$0xff]   ;;  %v1493_v5 = vld [vmem:[%s2193_s1 + $0x60] ss:$8 sps:$4 sm:$0xff]  }
   0x3   :  { %659 = vmatpush1.bf16.msra.mxu0 %v1487_v1  ;;  %701 = vmatprep.subr.bf16.mxu1 %v1488_v2  ;;  %v1494_v6 = vld [vmem:[%s2193_s1 + $0x164] ss:$8 sps:$4 sm:$0xff]   ;;  %v1496_v7 = vld [vmem:[%s2193_s1 + $0x160] ss:$8 sps:$4 sm:$0xff]   ;;  %v1497_v8 = vld [vmem:[%s2193_s1 + $0x54] ss:$8 sps:$4 sm:$0xff]  }
   0x4   :  { %702 = vmatpush1.bf16.msra.mxu1 %v1490_v3  ;;  %660 = vmatprep.subr.bf16.mxu0 %v1491_v4  ;;  %v1499_v9 = vld [vmem:[%s2193_s1 + $0x50] ss:$8 sps:$4 sm:$0xff]   ;;  %v1500_v10 = vld [vmem:[%s2193_s1 + $0x154] ss:$8 sps:$4 sm:$0xff]   ;;  %v1503_v11 = vld [vmem:[%s2193_s1 + $0x44] ss:$8 sps:$4 sm:$0xff]  }
   0x5   :  { %703 = vmatprep.subr.bf16.mxu1 %v1494_v6  ;;  %v1502_v12 = vld [vmem:[%s2193_s1 + $0x150] ss:$8 sps:$4 sm:$0xff]   ;;  %v1506_v13 = vld [vmem:[%s2193_s1 + $0x144] ss:$8 sps:$4 sm:$0xff]   ;;  %v1505_v14 = vld [vmem:[%s2193_s1 + $0x40] ss:$8 sps:$4 sm:$0xff]  }
   0x6   :  { %v1509_v15 = vld [vmem:[%s2193_s1 + $0x34] ss:$8 sps:$4 sm:$0xff]   ;;  %v1508_v16 = vld [vmem:[%s2193_s1 + $0x140] ss:$8 sps:$4 sm:$0xff]   ;;  %v1511_v18 = vld [vmem:[%s2193_s1 + $0x30] ss:$8 sps:$4 sm:$0xff]  }
   0x7   :  { %661 = vmatpush1.bf16.msra.mxu0 %v1493_v5  ;;  %v1512_v17 = vld [vmem:[%s2193_s1 + $0x134] ss:$8 sps:$4 sm:$0xff]   ;;  %v1515_v19 = vld [vmem:[%s2193_s1 + $0x24] ss:$8 sps:$4 sm:$0xff]   ;;  %v1514_v20 = vld [vmem:[%s2193_s1 + $0x130] ss:$8 sps:$4 sm:$0xff]  }
   0x8   :  { %662 = vmatprep.subr.bf16.mxu0 %v1497_v8  ;;  %704 = vmatpush1.bf16.msra.mxu1 %v1496_v7  ;;  %v1518_v21 = vld [vmem:[%s2193_s1 + $0x124] ss:$8 sps:$4 sm:$0xff]   ;;  %v1517_v22 = vld [vmem:[%s2193_s1 + $0x20] ss:$8 sps:$4 sm:$0xff]   ;;  %v1521_v23 = vld [vmem:[%s2193_s1 + $0x14] ss:$8 sps:$4 sm:$0xff]  }
   0x9   :  { %705 = vmatprep.subr.bf16.mxu1 %v1500_v10  ;;  %v1520_v24 = vld [vmem:[%s2193_s1 + $0x120] ss:$8 sps:$4 sm:$0xff]   ;;  %v1524_v25 = vld [vmem:[%s2193_s1 + $0x114] ss:$8 sps:$4 sm:$0xff]   ;;  %v1523_v26 = vld [vmem:[%s2193_s1 + $0x10] ss:$8 sps:$4 sm:$0xff]  }
   0xa   :  { %v1527_v27 = vld [vmem:[%s2193_s1 + $0x4] ss:$8 sps:$4 sm:$0xff]   ;;  %v1526_v28 = vld [vmem:[%s2193_s1 + $0x110] ss:$8 sps:$4 sm:$0xff]   ;;  %v1529_v30 = vld [vmem:[%s2193_s1] ss:$8 sps:$4 sm:$0xff]  }
   0xb   :  { %663 = vmatpush1.bf16.msra.mxu0 %v1499_v9  ;;  %v1530_v29 = vld [vmem:[%s2193_s1 + $0x104] ss:$8 sps:$4 sm:$0xff]   ;;  %v1533_v31 = vld [vmem:[%s2193_s1 + $0xf4] ss:$8 sps:$4 sm:$0xff]   ;;  %v1532_v32 = vld [vmem:[%s2193_s1 + $0x100] ss:$8 sps:$4 sm:$0xff]  }
   0xc   :  { %664 = vmatprep.subr.bf16.mxu0 %v1503_v11  ;;  %706 = vmatpush1.bf16.msra.mxu1 %v1502_v12  ;;  %v1536_v33 = vld [vmem:[%s2193_s1 + $0x1f4] ss:$8 sps:$4 sm:$0xff]   ;;  %v1535_v34 = vld [vmem:[%s2193_s1 + $0xf0] ss:$8 sps:$4 sm:$0xff]   ;;  %v1539_v35 = vld [vmem:[%s2193_s1 + $0xe4] ss:$8 sps:$4 sm:$0xff]  }
   0xd   :  { %707 = vmatprep.subr.bf16.mxu1 %v1506_v13  ;;  %v1538_v36 = vld [vmem:[%s2193_s1 + $0x1f0] ss:$8 sps:$4 sm:$0xff]   ;;  %v1542_v37 = vld [vmem:[%s2193_s1 + $0x1e4] ss:$8 sps:$4 sm:$0xff]   ;;  %v1541_v38 = vld [vmem:[%s2193_s1 + $0xe0] ss:$8 sps:$4 sm:$0xff]  }
   0xe   :  { %v1545_v39 = vld [vmem:[%s2193_s1 + $0xd4] ss:$8 sps:$4 sm:$0xff]   ;;  %v1544_v40 = vld [vmem:[%s2193_s1 + $0x1e0] ss:$8 sps:$4 sm:$0xff]   ;;  %v1547_v42 = vld [vmem:[%s2193_s1 + $0xd0] ss:$8 sps:$4 sm:$0xff]  }
   0xf   :  { %665 = vmatpush1.bf16.msra.mxu0 %v1505_v14  ;;  %v1548_v41 = vld [vmem:[%s2193_s1 + $0x1d4] ss:$8 sps:$4 sm:$0xff]   ;;  %v1551_v43 = vld [vmem:[%s2193_s1 + $0xc4] ss:$8 sps:$4 sm:$0xff]   ;;  %v1550_v44 = vld [vmem:[%s2193_s1 + $0x1d0] ss:$8 sps:$4 sm:$0xff]  }
  0x10   :  { %666 = vmatprep.subr.bf16.mxu0 %v1509_v15  ;;  %708 = vmatpush1.bf16.msra.mxu1 %v1508_v16  ;;  %v1554_v45 = vld [vmem:[%s2193_s1 + $0x1c4] ss:$8 sps:$4 sm:$0xff]   ;;  %v1553_v48 = vld [vmem:[%s2193_s1 + $0xc0] ss:$8 sps:$4 sm:$0xff]   ;;  %v1557_v50 = vld [vmem:[%s2193_s1 + $0xb4] ss:$8 sps:$4 sm:$0xff]  }
  0x11   :  { %709 = vmatprep.subr.bf16.mxu1 %v1512_v17  ;;  %v34_v46 = vld [vmem:[%s2194_s0 + $0x8] sm:$0xff]  ;;  %v41_v47 = vld [vmem:[%s2194_s0 + $0x40] sm:$0xff]  ;;  %v36_v52 = vld [vmem:[%s2194_s0 + $0x18] sm:$0xff] }
  0x12   :  { %v48_v49 = vpack.c.bf16 %v41_v47, %v34_v46  ;;  %v1556_v51 = vld [vmem:[%s2193_s1 + $0x1c0] ss:$8 sps:$4 sm:$0xff]   ;;  %v43_v53 = vld [vmem:[%s2194_s0 + $0x50] sm:$0xff]  ;;  %v1563_v57 = vld [vmem:[%s2193_s1 + $0xa4] ss:$8 sps:$4 sm:$0xff]  }
  0x13   :  { %667 = vmatpush1.bf16.msra.mxu0 %v1511_v18  ;;  %v1560_v54 = vld [vmem:[%s2193_s1 + $0x1b4] ss:$8 sps:$4 sm:$0xff]   ;;  %v50_v55 = vpack.c.bf16 %v43_v53, %v36_v52  ;;  %v1559_v56 = vld [vmem:[%s2193_s1 + $0xb0] ss:$8 sps:$4 sm:$0xff]   ;;  %v1566_v59 = vld [vmem:[%s2193_s1 + $0x1a4] ss:$8 sps:$4 sm:$0xff]  }
  0x14   :  { %668 = vmatprep.subr.bf16.mxu0 %v1515_v19  ;;  %710 = vmatpush1.bf16.msra.mxu1 %v1514_v20  ;;  %v1562_v58 = vld [vmem:[%s2193_s1 + $0x1b0] ss:$8 sps:$4 sm:$0xff]   ;;  %v1565_v60 = vld [vmem:[%s2193_s1 + $0xa0] ss:$8 sps:$4 sm:$0xff]   ;;  %v1569_v61 = vld [vmem:[%s2193_s1 + $0x94] ss:$8 sps:$4 sm:$0xff]  }
  0x15   :  { %711 = vmatprep.subr.bf16.mxu1 %v1518_v21  ;;  %690 = vmatprep.mubr.bf16.mxu0 %v48_v49  ;;  %v1568_v62 = vld [vmem:[%s2193_s1 + $0x1a0] ss:$8 sps:$4 sm:$0xff]   ;;  %v1572_v63 = vld [vmem:[%s2193_s1 + $0x194] ss:$8 sps:$4 sm:$0xff]   ;;  %v1571_v0 = vld [vmem:[%s2193_s1 + $0x90] ss:$8 sps:$4 sm:$0xff]  }
  0x16   :  { %733 = vmatprep.mubr.bf16.mxu1 %v50_v55  ;;  %v1574_v1 = vld [vmem:[%s2193_s1 + $0x190] ss:$8 sps:$4 sm:$0xff]   ;;  %v1575_v2 = vld [vmem:[%s2193_s1 + $0x84] ss:$8 sps:$4 sm:$0xff]   ;;  %v1577_v3 = vld [vmem:[%s2193_s1 + $0x80] ss:$8 sps:$4 sm:$0xff]  }
  0x17   :  { %669 = vmatpush1.bf16.msra.mxu0 %v1517_v22  ;;  %v1578_v4 = vld [vmem:[%s2193_s1 + $0x184] ss:$8 sps:$4 sm:$0xff]   ;;  %v1580_v6 = vld [vmem:[%s2193_s1 + $0x180] ss:$8 sps:$4 sm:$0xff]   ;;  %v40_v7 = vld [vmem:[%s2194_s0 + $0x38] sm:$0xff]  ;;  %v1672_v20 = vmov 0  }
  0x18   :  { %670 = vmatprep.subr.bf16.mxu0 %v1521_v23  ;;  %712 = vmatpush1.bf16.msra.mxu1 %v1520_v24  ;;  %v33_v5 = vld [vmem:[%s2194_s0] sm:$0xff]  ;;  %v1583_v8 = vld [vmem:[%s2193_s1 + $0x274] ss:$8 sps:$4 sm:$0xff]   ;;  %v42_v10 = vld [vmem:[%s2194_s0 + $0x48] sm:$0xff] }
  0x19   :  { %713 = vmatprep.subr.bf16.mxu1 %v1524_v25  ;;  %v35_v9 = vld [vmem:[%s2194_s0 + $0x10] sm:$0xff]  ;;  %v47_v11 = vpack.c.bf16 %v40_v7, %v33_v5  ;;  %v1586_v14 = vld [vmem:[%s2193_s1 + $0x264] ss:$8 sps:$4 sm:$0xff]   ;;  %v1626_v15 = vld [vmem:[%s2193_s1 + $0x300] ss:$8 sps:$4 sm:$0xff]  }
  0x1a   :  { %v1581_v12 = vld [vmem:[%s2193_s1 + $0x270] ss:$8 sps:$4 sm:$0xff]   ;;  %v49_v13 = vpack.c.bf16 %v42_v10, %v35_v9  ;;  %v1628_v16 = vld [vmem:[%s2193_s1 + $0x304] ss:$8 sps:$4 sm:$0xff]   ;;  %v1584_v17 = vld [vmem:[%s2193_s1 + $0x260] ss:$8 sps:$4 sm:$0xff]   ;;  %v154_v9 = vlaneseq }
  0x1b   :  { %671 = vmatpush1.bf16.msra.mxu0 %v1523_v26  ;;  %v1589_v18 = vld [vmem:[%s2193_s1 + $0x254] ss:$8 sps:$4 sm:$0xff]   ;;  %v38_v19 = vld [vmem:[%s2194_s0 + $0x28] sm:$0xff]  ;;  %v45_v23 = vld [vmem:[%s2194_s0 + $0x60] sm:$0xff] }
  0x1c   :  { %672 = vmatprep.subr.bf16.mxu0 %v1527_v27  ;;  %714 = vmatpush1.bf16.msra.mxu1 %v1526_v28  ;;  %v39_v21 = vld [vmem:[%s2194_s0 + $0x30] sm:$0xff]  ;;  %v46_v22 = vld [vmem:[%s2194_s0 + $0x68] sm:$0xff]  ;;  %v52_v24 = vpack.c.bf16 %v45_v23, %v38_v19  ;;  %v37_v53 = vld [vmem:[%s2194_s0 + $0x20] sm:$0xff] }
  0x1d   :  { %715 = vmatprep.subr.bf16.mxu1 %v1530_v29  ;;  %v1587_v25 = vld [vmem:[%s2193_s1 + $0x250] ss:$8 sps:$4 sm:$0xff]   ;;  %v1592_v26 = vld [vmem:[%s2193_s1 + $0x244] ss:$8 sps:$4 sm:$0xff]   ;;  %v53_v27 = vpack.c.bf16 %v46_v22, %v39_v21  ;;  %v1590_v28 = vld [vmem:[%s2193_s1 + $0x240] ss:$8 sps:$4 sm:$0xff]  }
  0x1e   :  { %v1595_v29 = vld [vmem:[%s2193_s1 + $0x234] ss:$8 sps:$4 sm:$0xff]   ;;  %v1617_v46 = vld [vmem:[%s2193_s1 + $0x2b0] ss:$8 sps:$4 sm:$0xff]   ;;  %v1622_v47 = vld [vmem:[%s2193_s1 + $0x2a4] ss:$8 sps:$4 sm:$0xff]  }
  0x1f   :  { %673 = vmatpush1.bf16.msra.mxu0 %v1529_v30  ;;  %v1593_v30 = vld [vmem:[%s2193_s1 + $0x230] ss:$8 sps:$4 sm:$0xff]   ;;  %v1625_v49 = vld [vmem:[%s2193_s1 + $0x294] ss:$8 sps:$4 sm:$0xff]   ;;  %v1629_v52 = vld [vmem:[%s2193_s1 + $0x280] ss:$8 sps:$4 sm:$0xff]  }
  0x20   :  { %674 = vmatprep.subr.bf16.mxu0 %v1533_v31  ;;  %716 = vmatpush1.bf16.msra.mxu1 %v1532_v32  ;;  %v1598_v31 = vld [vmem:[%s2193_s1 + $0x224] ss:$8 sps:$4 sm:$0xff]   ;;  %v1596_v32 = vld [vmem:[%s2193_s1 + $0x220] ss:$8 sps:$4 sm:$0xff]  }
  0x21   :  { %717 = vmatprep.subr.bf16.mxu1 %v1536_v33  ;;  %v1601_v33 = vld [vmem:[%s2193_s1 + $0x214] ss:$8 sps:$4 sm:$0xff]   ;;  %v1645_v5 = vld [vmem:[%s2195_s3 + $0x8] sm:$0xff]   ;;  %v1647_v7 = vld [vmem:[%s2195_s3] sm:$0xff]  }
  0x23   :  { %675 = vmatpush2.bf16.msra.mxu0 %v1535_v34  ;;  %v1599_v34 = vld [vmem:[%s2193_s1 + $0x210] ss:$8 sps:$4 sm:$0xff]  }
  0x24   :  { %676 = vmatprep.subr.bf16.mxu0 %v1539_v35  ;;  %718 = vmatpush2.bf16.msra.mxu1 %v1538_v36  ;;  %v1604_v35 = vld [vmem:[%s2193_s1 + $0x204] ss:$8 sps:$4 sm:$0xff]   ;;  %v1602_v36 = vld [vmem:[%s2193_s1 + $0x200] ss:$8 sps:$4 sm:$0xff]  }
  0x25   :  { %719 = vmatprep.subr.bf16.mxu1 %v1542_v37  ;;  %v1607_v37 = vld [vmem:[%s2193_s1 + $0x2f4] ss:$8 sps:$4 sm:$0xff]  }
  0x27   :  { %677 = vmatpush2.bf16.msra.mxu0 %v1541_v38  ;;  %v1605_v38 = vld [vmem:[%s2193_s1 + $0x2f0] ss:$8 sps:$4 sm:$0xff]  }
  0x28   :  { %678 = vmatprep.subr.bf16.mxu0 %v1545_v39  ;;  %720 = vmatpush2.bf16.msra.mxu1 %v1544_v40  ;;  %v1610_v39 = vld [vmem:[%s2193_s1 + $0x2e4] ss:$8 sps:$4 sm:$0xff]   ;;  %v1608_v40 = vld [vmem:[%s2193_s1 + $0x2e0] ss:$8 sps:$4 sm:$0xff]  }
  0x29   :  { %721 = vmatprep.subr.bf16.mxu1 %v1548_v41  ;;  %v1613_v41 = vld [vmem:[%s2193_s1 + $0x2d4] ss:$8 sps:$4 sm:$0xff]  }
  0x2b   :  { %679 = vmatpush2.bf16.msra.mxu0 %v1547_v42  ;;  %v1611_v42 = vld [vmem:[%s2193_s1 + $0x2d0] ss:$8 sps:$4 sm:$0xff]  }
  0x2c   :  { %680 = vmatprep.subr.bf16.mxu0 %v1551_v43  ;;  %722 = vmatpush2.bf16.msra.mxu1 %v1550_v44  ;;  %v1616_v43 = vld [vmem:[%s2193_s1 + $0x2c4] ss:$8 sps:$4 sm:$0xff]   ;;  %v1614_v44 = vld [vmem:[%s2193_s1 + $0x2c0] ss:$8 sps:$4 sm:$0xff]  }
  0x2d   :  { %723 = vmatprep.subr.bf16.mxu1 %v1554_v45  ;;  %v1619_v45 = vld [vmem:[%s2193_s1 + $0x2b4] ss:$8 sps:$4 sm:$0xff]  }
  0x2f   :  { %681 = vmatpush2.bf16.msra.mxu0 %v1553_v48  ;;  %v1620_v48 = vld [vmem:[%s2193_s1 + $0x2a0] ss:$8 sps:$4 sm:$0xff]  }
  0x30   :  { %682 = vmatprep.subr.bf16.mxu0 %v1557_v50  ;;  %724 = vmatpush2.bf16.msra.mxu1 %v1556_v51  ;;  %v1623_v50 = vld [vmem:[%s2193_s1 + $0x290] ss:$8 sps:$4 sm:$0xff]   ;;  %v1631_v51 = vld [vmem:[%s2193_s1 + $0x284] ss:$8 sps:$4 sm:$0xff]  }
  0x31   :  { %725 = vmatprep.subr.bf16.mxu1 %v1560_v54  ;;  %v44_v54 = vld [vmem:[%s2194_s0 + $0x58] sm:$0xff] }
  0x32   :  { %v51_v55 = vpack.c.bf16 %v44_v54, %v37_v53  ;;  %v1648_v53 = vld [vmem:[%s2196_s5 + $0x38] sm:$0xff]  }
  0x33   :  { %683 = vmatpush2.bf16.msra.mxu0 %v1559_v56  ;;  %v1632_v56 = vld [vmem:[%s2195_s3 + $0x78] sm:$0xff]  }
  0x34   :  { %684 = vmatprep.subr.bf16.mxu0 %v1563_v57  ;;  %726 = vmatpush2.bf16.msra.mxu1 %v1562_v58  ;;  %v1633_v57 = vld [vmem:[%s2195_s3 + $0x38] sm:$0xff]   ;;  %v1634_v58 = vld [vmem:[%s2195_s3 + $0x70] sm:$0xff]  }
  0x35   :  { %727 = vmatprep.subr.bf16.mxu1 %v1566_v59  ;;  %v1635_v59 = vld [vmem:[%s2195_s3 + $0x30] sm:$0xff]  }
  0x37   :  { %685 = vmatpush2.bf16.msra.mxu0 %v1565_v60  ;;  %v1636_v60 = vld [vmem:[%s2195_s3 + $0x68] sm:$0xff]  }
  0x38   :  { %686 = vmatprep.subr.bf16.mxu0 %v1569_v61  ;;  %728 = vmatpush2.bf16.msra.mxu1 %v1568_v62  ;;  %v1637_v61 = vld [vmem:[%s2195_s3 + $0x28] sm:$0xff]   ;;  %v1638_v62 = vld [vmem:[%s2195_s3 + $0x60] sm:$0xff]  }
  0x39   :  { %729 = vmatprep.subr.bf16.mxu1 %v1572_v63  ;;  %v1639_v63 = vld [vmem:[%s2195_s3 + $0x20] sm:$0xff]  }
  0x3b   :  { %687 = vmatpush2.bf16.msra.mxu0 %v1571_v0  ;;  %v1640_v0 = vld [vmem:[%s2195_s3 + $0x58] sm:$0xff]  }
  0x3c   :  { %688 = vmatprep.subr.bf16.mxu0 %v1575_v2  ;;  %730 = vmatpush2.bf16.msra.mxu1 %v1574_v1  ;;  %v1641_v1 = vld [vmem:[%s2195_s3 + $0x18] sm:$0xff]   ;;  %v1642_v2 = vld [vmem:[%s2195_s3 + $0x50] sm:$0xff]  }
  0x3d   :  { %731 = vmatprep.subr.bf16.mxu1 %v1578_v4  ;;  %v1644_v4 = vld [vmem:[%s2195_s3 + $0x48] sm:$0xff]  }
  0x3f   :  { %689 = vmatpush2.bf16.msra.mxu0 %v1577_v3  ;;  %v1643_v3 = vld [vmem:[%s2195_s3 + $0x10] sm:$0xff]  }
  0x40   :  { %744 = vmatprep.subr.bf16.mxu0 %v1583_v8  ;;  %732 = vmatpush2.bf16.msra.mxu1 %v1580_v6  ;;  %v1646_v6 = vld [vmem:[%s2195_s3 + $0x40] sm:$0xff]   ;;  %v1673_v8 = vmov 0.0  }
  0x41   :  { %801 = vmatprep.subr.bf16.mxu1 %v1628_v16 }
  0x42   :  { %691 = vmatmul.mubr.bf16.vlgmr.msra.gmra.mxu0 %v47_v11  ;;  %v155_v11 = vshrl.u32 %v154_v9, 7 }
  0x43   :  { %745 = vmatpush1.bf16.msra.mxu0 %v1581_v12  ;;  %734 = vmatmul.mubr.bf16.vlgmr.msra.gmra.mxu1 %v49_v13 }
  0x44   :  { %746 = vmatprep.subr.bf16.mxu0 %v1586_v14  ;;  %819 = vmatprep.mubr.bf16.mxu1 %v1672_v20  ;;  %v160_v14 = vsub.s32 1, %v155_v11  ;;  %v156_v16 = vsub.s32 0, %v155_v11 }
  0x45   :  { %802 = vmatpush1.bf16.msra.mxu1 %v1626_v15  ;;  %776 = vmatprep.mubr.bf16.mxu0 %v52_v24  ;;  %v152_v15 = vld [vmem:[%s2197_s2] sm:$0x3] }
  0x46   :  { %1402 = vmatprep.subr.bf16.mxu1 %v1632_v56  ;;  %v161_v19 = vrot.slane %v152_v15, %v160_v14  ;;  %v157_v20 = vrot.slane %v152_v15, %v156_v16  ;;  %v1650_v56 = vld [vmem:[%s2196_s5 + $0x28] sm:$0xff]   ;;  %v1661_v16 = vld [vmem:[%s2198_s7 + $0x10] sm:$0xff]  }
  0x47   :  { %747 = vmatpush1.bf16.msra.mxu0 %v1584_v17 }
  0x48   :  { %748 = vmatprep.subr.bf16.mxu0 %v1589_v18 }
  0x4b   :  { %749 = vmatpush1.bf16.msra.mxu0 %v1587_v25  ;;  %1366 = vmatmul.mubr.msk.bf16.vlgmr.msra.gmra.mxu1 %vm654_vm0, %v53_v27 }
  0x4c   :  { %750 = vmatprep.subr.bf16.mxu0 %v1592_v26  ;;  %1403 = vmatpush3.bf16.msra.mxu1 %v1633_v57  ;;  %v1651_v57 = vld [vmem:[%s2196_s5 + $0x20] sm:$0xff]  }
  0x4d   :  { %1404 = vmatprep.subr.bf16.mxu1 %v1634_v58  ;;  %v1652_v58 = vld [vmem:[%s2196_s5 + $0x18] sm:$0xff]  }
  0x4f   :  { %751 = vmatpush1.bf16.msra.mxu0 %v1590_v28 }
  0x50   :  { %752 = vmatprep.subr.bf16.mxu0 %v1595_v29  ;;  %1405 = vmatpush3.bf16.msra.mxu1 %v1635_v59  ;;  %v1653_v59 = vld [vmem:[%s2196_s5 + $0x10] sm:$0xff]  }
  0x51   :  { %1406 = vmatprep.subr.bf16.mxu1 %v1636_v60  ;;  %v1654_v60 = vld [vmem:[%s2196_s5 + $0x8] sm:$0xff]  }
  0x53   :  { %753 = vmatpush1.bf16.msra.mxu0 %v1593_v30 }
  0x54   :  { %754 = vmatprep.subr.bf16.mxu0 %v1598_v31  ;;  %1407 = vmatpush3.bf16.msra.mxu1 %v1637_v61  ;;  %v1655_v61 = vld [vmem:[%s2196_s5] sm:$0xff]  }
  0x55   :  { %1408 = vmatprep.subr.bf16.mxu1 %v1638_v62  ;;  %v1656_v62 = vld [vmem:[%s2198_s7 + $0x38] sm:$0xff]  }
  0x57   :  { %755 = vmatpush1.bf16.msra.mxu0 %v1596_v32 }
  0x58   :  { %756 = vmatprep.subr.bf16.mxu0 %v1601_v33  ;;  %1409 = vmatpush3.bf16.msra.mxu1 %v1639_v63  ;;  %v1657_v63 = vld [vmem:[%s2198_s7 + $0x30] sm:$0xff]  }
  0x59   :  { %1410 = vmatprep.subr.bf16.mxu1 %v1640_v0  ;;  %v1658_v0 = vld [vmem:[%s2198_s7 + $0x28] sm:$0xff]  }
  0x5b   :  { %757 = vmatpush1.bf16.msra.mxu0 %v1599_v34 }
  0x5c   :  { %758 = vmatprep.subr.bf16.mxu0 %v1604_v35  ;;  %1411 = vmatpush3.bf16.msra.mxu1 %v1641_v1  ;;  %v1659_v1 = vld [vmem:[%s2198_s7 + $0x20] sm:$0xff]  }
  0x5d   :  { %1412 = vmatprep.subr.bf16.mxu1 %v1642_v2  ;;  %v1660_v2 = vld [vmem:[%s2198_s7 + $0x18] sm:$0xff]  }
  0x5f   :  { %759 = vmatpush1.bf16.msra.mxu0 %v1602_v36 }
  0x60   :  { %760 = vmatprep.subr.bf16.mxu0 %v1607_v37  ;;  %1413 = vmatpush3.bf16.msra.mxu1 %v1643_v3 }
  0x61   :  { %1414 = vmatprep.subr.bf16.mxu1 %v1644_v4 }
  0x63   :  { %761 = vmatpush2.bf16.msra.mxu0 %v1605_v38 }
  0x64   :  { %762 = vmatprep.subr.bf16.mxu0 %v1610_v39  ;;  %1415 = vmatpush3.bf16.msra.mxu1 %v1645_v5 }
  0x65   :  { %1416 = vmatprep.subr.bf16.mxu1 %v1646_v6  ;;  %v1367_v6 = vld [vmem:[%s2199_s4] ss:$0 sm:$0xff] }
  0x67   :  { %763 = vmatpush2.bf16.msra.mxu0 %v1608_v40 }
  0x68   :  { %764 = vmatprep.subr.bf16.mxu0 %v1613_v41  ;;  %1417 = vmatpush3.bf16.msra.mxu1 %v1647_v7 }
  0x69   :  { %1442 = vmatprep.subr.bf16.mxu1 %v1673_v8 }
  0x6b   :  { %765 = vmatpush2.bf16.msra.mxu0 %v1611_v42 }
  0x6c   :  { %766 = vmatprep.subr.bf16.mxu0 %v1616_v43 }
  0x6f   :  { %767 = vmatpush2.bf16.msra.mxu0 %v1614_v44 }
  0x70   :  { %768 = vmatprep.subr.bf16.mxu0 %v1619_v45 }
  0x73   :  { %769 = vmatpush2.bf16.msra.mxu0 %v1617_v46 }
  0x74   :  { %770 = vmatprep.subr.bf16.mxu0 %v1622_v47 }
  0x77   :  { %771 = vmatpush2.bf16.msra.mxu0 %v1620_v48 }
  0x78   :  { %772 = vmatprep.subr.bf16.mxu0 %v1625_v49 }
  0x7b   :  { %773 = vmatpush2.bf16.msra.mxu0 %v1623_v50 }
  0x7c   :  { %774 = vmatprep.subr.bf16.mxu0 %v1631_v51 }
  0x7f   :  { %775 = vmatpush2.bf16.msra.mxu0 %v1629_v52 }
  0x80   :  { %1462 = vmatprep.subr.bf16.mxu0 %v1673_v8 }
  0x82   :  { %777 = vmatmul.mubr.bf16.vlgmr.msra.gmra.mxu0 %v51_v55  ;;  %v1649_v55 = vld [vmem:[%s2196_s5 + $0x30] sm:$0xff]  }
  0x83   :  { %1478 = vmatprep.mubr.msk.bf16.mxu0 %vm1674_vm1, %v1673_v8  ;;  %1463 = vmatpush3.bf16.msra.mxu0 %v1656_v62 }
  0x84   :  { %1464 = vmatprep.subr.bf16.mxu0 %v1673_v8 }
  0x87   :  { %1465 = vmatpush3.bf16.msra.mxu0 %v1657_v63 }
  0x88   :  { %1466 = vmatprep.subr.bf16.mxu0 %v1673_v8 }
  0x8b   :  { %1467 = vmatpush3.bf16.msra.mxu0 %v1658_v0 }
  0x8c   :  { %1468 = vmatprep.subr.bf16.mxu0 %v1673_v8 }
  0x8f   :  { %1469 = vmatpush3.bf16.msra.mxu0 %v1659_v1 }
  0x90   :  { %1470 = vmatprep.subr.bf16.mxu0 %v1673_v8 }
  0x93   :  { %1471 = vmatpush3.bf16.msra.mxu0 %v1660_v2 }
  0x94   :  { %1472 = vmatprep.subr.bf16.mxu0 %v1673_v8 }
  0x97   :  { %1473 = vmatpush3.bf16.msra.mxu0 %v1661_v16 }
  0x98   :  { %1474 = vmatprep.subr.bf16.mxu0 %v1673_v8 }
 0x102   :  { %v692_v12 = vpop.f32.mrf.mxu0 }
 0x103   :  { %v735_v10 = vpop.f32.mrf.mxu1  ;;  %v693_v25 = vadd.f32 %v692_v12, %v157_v20 }
 0x104   :  { %v694_v17 = vpop.f32.mrf.mxu0 }
 0x105   :  { %v737_v13 = vpop.f32.mrf.mxu1  ;;  %v695_v24 = vadd.f32 %v694_v17, %v161_v19  ;;  %v736_v32 = vadd.f32 %v735_v10, %v693_v25  ;;  %v1662_v17 = vld [vmem:[%s2198_s7 + $0x8] sm:$0xff]  }
 0x106   :  { %v696_v21 = vpop.f32.mrf.mxu0  ;;  %1475 = vmatpush3.bf16.msra.mxu0 %v1662_v17 }
 0x107   :  { %v739_v18 = vpop.f32.mrf.mxu1  ;;  %v697_v27 = vadd.f32 %v696_v21, %v157_v20  ;;  %v738_v30 = vadd.f32 %v737_v13, %v695_v24  ;;  %1476 = vmatprep.subr.bf16.mxu0 %v1673_v8 }
 0x108   :  { %v698_v26 = vpop.f32.mrf.mxu0 }
 0x109   :  { %v741_v22 = vpop.f32.mrf.mxu1  ;;  %v699_v31 = vadd.f32 %v698_v26, %v161_v19  ;;  %v740_v34 = vadd.f32 %v739_v18, %v697_v27  ;;  %v1663_v18 = vld [vmem:[%s2198_s7] sm:$0xff]  }
 0x10a   :  { %1477 = vmatpush3.bf16.msra.mxu0 %v1663_v18  ;;  %v1384_v19 = vld [vmem:[%s2200_s6] ss:$0 sm:$0xff] }
 0x10b   :  { %v821_v23 = vpop.f32.mrf.mxu1  ;;  %v742_v39 = vadd.f32 %v741_v22, %v699_v31 }
 0x10d   :  { %v823_v28 = vpop.f32.mrf.mxu1 }
 0x10f   :  { %v825_v37 = vpop.f32.mrf.mxu1 }
 0x111   :  { %v827_v46 = vpop.f32.mrf.mxu1 }
 0x142   :  { %v778_v29 = vpop.f32.mrf.mxu0 }
 0x143   :  { %v779_v36 = vadd.f32 %v778_v29, %v736_v32 }
 0x144   :  { %v780_v33 = vpop.f32.mrf.mxu0 }
 0x145   :  { %v781_v35 = vadd.f32 %v780_v33, %v738_v30  ;;  %v822_v45 = vadd.f32 %v821_v23, %v779_v36 }
 0x146   :  { %v782_v38 = vpop.f32.mrf.mxu0 }
 0x147   :  { %v783_v40 = vadd.f32 %v782_v38, %v740_v34  ;;  %v824_v42 = vadd.f32 %v823_v28, %v781_v35  ;;  %v830_v51 = vmax.f32 %v822_v45, 0.0 }
 0x148   :  { %v784_v41 = vpop.f32.mrf.mxu0 }
 0x149   :  { %v826_v43 = vadd.f32 %v825_v37, %v783_v40  ;;  %v785_v44 = vadd.f32 %v784_v41, %v742_v39  ;;  %v831_v49 = vmax.f32 %v824_v42, 0.0 }
 0x14b   :  { %v828_v47 = vadd.f32 %v827_v46, %v785_v44  ;;  %v832_v48 = vmax.f32 %v826_v43, 0.0 }
 0x14d   :  { %v833_v50 = vmax.f32 %v828_v47, 0.0  ;;  %v834_v54 = vpack.c.bf16 %v832_v48, %v830_v51 }
 0x14f   :  { %v835_v52 = vpack.c.bf16 %v833_v50, %v831_v49 }
 0x151   :  { %1003 = vmatprep.mubr.bf16.mxu1 %v835_v52 }
 0x152   :  { %1004 = vmatmul.mubr.bf16.vlgmr.msra.gmra.mxu1 %v834_v54 }
 0x153   :  { %1443 = vmatpush3.bf16.msra.mxu1 %v1648_v53  ;;  %1458 = vmatprep.mubr.msk.bf16.mxu1 %vm1674_vm1, %v1673_v8 }
 0x154   :  { %1444 = vmatprep.subr.bf16.mxu1 %v1673_v8 }
 0x157   :  { %1445 = vmatpush3.bf16.msra.mxu1 %v1649_v55 }
 0x158   :  { %1446 = vmatprep.subr.bf16.mxu1 %v1673_v8 }
 0x15b   :  { %1447 = vmatpush3.bf16.msra.mxu1 %v1650_v56 }
 0x15c   :  { %1448 = vmatprep.subr.bf16.mxu1 %v1673_v8 }
 0x15f   :  { %1449 = vmatpush3.bf16.msra.mxu1 %v1651_v57 }
 0x160   :  { %1450 = vmatprep.subr.bf16.mxu1 %v1673_v8 }
 0x163   :  { %1451 = vmatpush3.bf16.msra.mxu1 %v1652_v58 }
 0x164   :  { %1452 = vmatprep.subr.bf16.mxu1 %v1673_v8 }
 0x167   :  { %1453 = vmatpush3.bf16.msra.mxu1 %v1653_v59 }
 0x168   :  { %1454 = vmatprep.subr.bf16.mxu1 %v1673_v8 }
 0x16b   :  { %1455 = vmatpush3.bf16.msra.mxu1 %v1654_v60 }
 0x16c   :  { %1456 = vmatprep.subr.bf16.mxu1 %v1673_v8  ;;  %v1393_v8 = vld [vmem:[%s2201_s8] ss:$0 sm:$0xff] }
 0x16f   :  { %1457 = vmatpush3.bf16.msra.mxu1 %v1655_v61 }
 0x212   :  { %v1418_v3 = vpop.f32.mrf.mxu1 }
 0x214   :  { %v1419_v4 = vpop.f32.mrf.mxu1 }
 0x215   :  { %v1420_v5 = vadd.f32 %v1419_v4, %v1418_v3 }
 0x216   :  { %v1421_v7 = vpop.f32.mrf.mxu1 }
 0x217   :  { %v1006_v10 = vadd.f32 %v1420_v5, %v1367_v6 }
 0x218   :  { %v1422_v9 = vpop.f32.mrf.mxu1 }
 0x219   :  { %v1423_v11 = vadd.f32 %v1422_v9, %v1421_v7  ;;  %v1012_v13 = vmax.f32 %v1006_v10, 0.0 }
 0x21b   :  { %v1009_v12 = vadd.f32 %v1423_v11, %v1367_v6 }
 0x21d   :  { %v1013_v14 = vmax.f32 %v1009_v12, 0.0 }
 0x21f   :  { %v1014_v15 = vpack.c.bf16 %v1013_v14, %v1012_v13 }
 0x221   :  { %1459 = vmatmul.mubr.bf16.vlgmr.msra.gmra.mxu1 %v1014_v15 }
 0x2e1   :  { %v1120_v20 = vpop.f32.mrf.mxu1 }
 0x2e2   :  { %v1121_v22 = vadd.f32 %v1384_v19, %v1120_v20 }
 0x2e3   :  { %v1460_v21 = vpop.f32.mrf.mxu1 }
 0x2e4   :  { %v1127_v26 = vmax.f32 %v1121_v22, 0.0 }
 0x2e5   :  { %v1123_v23 = vpop.f32.mrf.mxu1 }
 0x2e6   :  { %v1124_v24 = vadd.f32 %v1384_v19, %v1123_v23 }
 0x2e7   :  { %v1461_v25 = vpop.f32.mrf.mxu1 }
 0x2e8   :  { %v1128_v27 = vmax.f32 %v1124_v24, 0.0 }
 0x2ea   :  { %v1129_v28 = vpack.c.bf16 %v1128_v27, %v1127_v26 }
 0x2ec   :  { %1479 = vmatmul.mubr.bf16.vlgmr.msra.gmra.mxu0 %v1129_v28 }
 0x3ac   :  { %v1235_v29 = vpop.f32.mrf.mxu0 }
 0x3ad   :  { %v1236_v30 = vadd.f32 %v1393_v8, %v1235_v29 }
 0x3ae   :  { %v1480_v31 = vpop.f32.mrf.mxu0 }
 0x3af   :  { %1242 = vmax.xlane.f32.xlu0 %v1236_v30 }
 0x3b0   :  { %v1238_v32 = vpop.f32.mrf.mxu0 }
 0x3b1   :  { %v1239_v33 = vadd.f32 %v1393_v8, %v1238_v32 }
 0x3b2   :  { %v1481_v34 = vpop.f32.mrf.mxu0 }
 0x3b3   :  { %1244 = vmax.xlane.f32.xlu0 %v1239_v33 }
 0x438   :  { %v1243_v35 = vpop.xlane.xlu0 %1242 }
 0x439   :  { %v1246_v36 = vsub.f32 %v1236_v30, %v1243_v35 }
 0x43b   :  { %v1248_v37 = vmul.f32 1.442695, %v1246_v36 }
 0x43c   :  { %v1245_v38 = vpop.xlane.xlu0 %1244 }
 0x43d   :  { %v1247_v39 = vsub.f32 %v1239_v33, %v1245_v38  ;;  %1664 = vpow2.f32 %v1248_v37 }
 0x43f   :  { %v1250_v40 = vmul.f32 1.442695, %v1247_v39 }
 0x441   :  { %1666 = vpow2.f32 %v1250_v40 }
 0x44a   :  { %v1665_v41 = vpop.eup %1664 }
 0x44b   :  { %1252 = vadd.xlane.f32.xlu1 %v1665_v41 }
 0x44e   :  { %v1667_v42 = vpop.eup %1666 }
 0x44f   :  { %1254 = vadd.xlane.f32.xlu1 %v1667_v42 }
 0x4d4   :  { %v1253_v43 = vpop.xlane.xlu1 %1252 }
 0x4d5   :  { %1668 = vlog2.f32 %v1253_v43 }
 0x4d8   :  { %v1255_v44 = vpop.xlane.xlu1 %1254 }
 0x4d9   :  { %1670 = vlog2.f32 %v1255_v44 }
 0x4e2   :  { %v1669_v45 = vpop.eup %1668 }
 0x4e3   :  { %v1257_v46 = vmul.f32 0.6931472, %v1669_v45 }
 0x4e5   :  { %v1260_v47 = vsub.f32 %v1246_v36, %v1257_v46 }
 0x4e6   :  { %v1671_v48 = vpop.eup %1670 }
 0x4e7   :  { %1262 = vst [vmem:[%s2202_s9] sm:$0xff] %v1260_v47  ;;  %v1259_v49 = vmul.f32 0.6931472, %v1671_v48 }
 0x4e9   :  { %v1261_v50 = vsub.f32 %v1247_v39, %v1259_v49 }
 0x4eb   :  { %1263 = vst [vmem:[%s2202_s9 + $0x8] sm:$0xff] %v1261_v50 }

</bundles_post_ra>
